<compile_context>
chip_gen: v5e
topology: v5e:2x2
jax: 0.10.0
libtpu: 0.0.40
codegen_flags: <defaults>
</compile_context>

<pallas_src>
import functools

import numpy as np
import jax
import jax.numpy as jnp
from jax.experimental import pallas as pl
from jax.experimental.pallas import tpu as pltpu


def _round_up(x, m):
    return ((x + m - 1) // m) * m


# ---------------------------------------------------------------------------
# Fused kernel: in-VMEM im2col + one 2-D conv matmul + ReLU + masked max-pool
# + highway + fc + log_softmax.  All feature axes live on the 128-lane dim.
# ---------------------------------------------------------------------------
def _fused_kernel(emb_ref, wconv_ref, bconv_ref, mask_ref,
                  wh_ref, bh_ref, wfc_ref, bfc_ref,
                  feat_ref, score_ref, logp_ref,
                  *, num_classes, max_f, lp):
    tb = emb_ref.shape[0]
    e = emb_ref[...]                                        # (TB, Sp, E) bf16

    # In-VMEM im2col: patches[b, t, j*E + c] = e[b, t + j, c]
    patches = jnp.concatenate([e[:, j:j + lp, :] for j in range(max_f)],
                              axis=-1)                      # (TB, Lp, max_f*E)
    k = patches.shape[-1]
    f_tot = wconv_ref.shape[-1]

    # Single big lane-dense 2-D matmul for ALL filter banks (fp32 accumulate).
    acc = jnp.dot(patches.reshape(tb * lp, k), wconv_ref[...],
                  preferred_element_type=jnp.float32)       # (TB*Lp, F)
    acc = acc.reshape(tb, lp, f_tot) + bconv_ref[...]       # + bias (1, F)
    acc = jnp.maximum(acc, 0.0) * mask_ref[...]             # ReLU, zero invalid t
    pred = jnp.max(acc, axis=1)                             # time max-pool (TB, F)

    # --- highway layer ------------------------------------------------------
    h = jnp.dot(pred.astype(wh_ref.dtype), wh_ref[...],
                preferred_element_type=jnp.float32) + bh_ref[...]
    sig = jax.nn.sigmoid(h)
    highway = sig * jnp.maximum(h, 0.0) + (1.0 - sig) * pred
    feat_ref[...] = highway                                 # dropout = identity (eval)

    # --- final fc + log_softmax (lane-padded to 128 columns) ----------------
    score = jnp.dot(highway.astype(wfc_ref.dtype), wfc_ref[...],
                    preferred_element_type=jnp.float32) + bfc_ref[...]
    score_ref[...] = score                                  # padded cols sliced off

    col = jax.lax.broadcasted_iota(jnp.int32, score.shape, 1)
    s_m = jnp.where(col < num_classes, score, jnp.float32(-1e30))
    m = jnp.max(s_m, axis=1, keepdims=True)
    z = s_m - m
    lse = jnp.log(jnp.sum(jnp.exp(z), axis=1, keepdims=True))
    logp_ref[...] = z - lse


def _choose_tb(bp, cap=256):
    """Largest multiple-of-8 divisor of bp up to `cap`; prefer >=2 grid steps."""
    cands = [t for t in range(8, bp + 1, 8) if bp % t == 0] or [bp]
    fit = [t for t in cands if t <= cap] or [min(cands)]
    tb = max(fit)
    multi = [t for t in fit if bp // t >= 2]
    if bp // tb < 2 and multi:
        tb = max(multi)       # keep both TensorCores busy on v7x
    return tb


def _fused_call(emb, w_conv, b_conv, mask, wh, bh, wfc, bfc, *,
                num_classes, max_f, lp):
    Bp, Sp, E = emb.shape
    K, F = w_conv.shape
    Cp = wfc.shape[-1]
    TB = _choose_tb(Bp)
    kernel = functools.partial(_fused_kernel, num_classes=num_classes,
                               max_f=max_f, lp=lp)
    return pl.pallas_call(
        kernel,
        out_shape=(
            jax.ShapeDtypeStruct((Bp, F), jnp.float32),    # feature
            jax.ShapeDtypeStruct((Bp, Cp), jnp.float32),   # padded score slab
            jax.ShapeDtypeStruct((Bp, Cp), jnp.float32),   # padded log-softmax slab
        ),
        grid=(Bp // TB,),
        in_specs=[
            pl.BlockSpec((TB, Sp, E), lambda i: (i, 0, 0)),  # embeddings (bf16)
            pl.BlockSpec((K, F), lambda i: (0, 0)),          # fused conv weights
            pl.BlockSpec((1, F), lambda i: (0, 0)),          # fused conv bias
            pl.BlockSpec((lp, F), lambda i: (0, 0)),         # valid-time mask
            pl.BlockSpec((F, F), lambda i: (0, 0)),          # highway weight
            pl.BlockSpec((1, F), lambda i: (0, 0)),          # highway bias
            pl.BlockSpec((F, Cp), lambda i: (0, 0)),         # fc weight (lane-padded)
            pl.BlockSpec((1, Cp), lambda i: (0, 0)),         # fc bias (lane-padded)
        ],
        out_specs=(
            pl.BlockSpec((TB, F), lambda i: (i, 0)),
            pl.BlockSpec((TB, Cp), lambda i: (i, 0)),
            pl.BlockSpec((TB, Cp), lambda i: (i, 0)),
        ),
        compiler_params=pltpu.CompilerParams(
            dimension_semantics=("parallel",),
            vmem_limit_bytes=32 * 1024 * 1024),
    )(emb, w_conv, b_conv, mask, wh, bh, wfc, bfc)


# ---------------------------------------------------------------------------
# Full forward pass (glue in plain JAX: embedding gather + pad + slicing).
# ---------------------------------------------------------------------------
def discriminator_forward(params, x, *, filter_sizes, num_classes):
    B, S = x.shape
    emb = params['emb'][x].astype(jnp.bfloat16)          # (B, S, E) gather, bf16 early
    E = emb.shape[-1]
    max_f = max(filter_sizes)
    L = S - min(filter_sizes) + 1
    lp = _round_up(L, 16)                                # sublane-friendly conv length
    sp = lp + max_f - 1
    Bp = _round_up(max(B, 8), 8)
    emb = jnp.pad(emb, ((0, Bp - B), (0, sp - S), (0, 0)))   # (Bp, Sp, E), zeros inert

    feature, score_pad, logp_pad = _fused_call(
        emb, params['w_conv'], params['b_conv'], params['pool_mask'],
        params['wh'], params['bh'], params['wfc'], params['bfc'],
        num_classes=num_classes, max_f=max_f, lp=lp)

    return {'pred': logp_pad[:B, :num_classes],
            'feature': feature[:B],
            'score': score_pad[:B, :num_classes]}


def init_params(key, seq_len, vocab_size, emb_dim, filter_sizes, num_filters,
                num_classes, class_pad=128):
    F = sum(num_filters)
    max_f = max(filter_sizes)
    L = seq_len - min(filter_sizes) + 1
    lp = _round_up(L, 16)
    keys = jax.random.split(key, 5 + 2 * len(filter_sizes))
    params = {}
    params['emb'] = 0.1 * jax.random.normal(
        keys[0], (vocab_size + 1, emb_dim), jnp.float32)

    w_banks, b_banks, m_cols = [], [], []
    for i, (f, nf) in enumerate(zip(filter_sizes, num_filters)):
        # PyTorch Conv2d weight (nf, 1, f, E) -> layout (f, E, nf), zero-padded
        # along the tap axis to max_f, flattened to (max_f*E, nf).
        w = 0.1 * jax.random.normal(keys[1 + 2 * i], (f, emb_dim, nf), jnp.float32)
        w = jnp.pad(w, ((0, max_f - f), (0, 0), (0, 0)))
        w_banks.append(w.reshape(max_f * emb_dim, nf))
        b_banks.append(0.1 * jax.random.normal(keys[2 + 2 * i], (1, nf), jnp.float32))
        valid = (np.arange(lp) < (seq_len - f + 1)).astype(np.float32)
        m_cols.append(np.tile(valid[:, None], (1, nf)))
    params['w_conv'] = jnp.concatenate(w_banks, axis=1).astype(jnp.bfloat16)  # (max_f*E, F)
    params['b_conv'] = jnp.concatenate(b_banks, axis=1)                       # (1, F)
    params['pool_mask'] = jnp.asarray(np.concatenate(m_cols, axis=1))         # (Lp, F)

    k = 1 + 2 * len(filter_sizes)
    # nn.Linear weight (out, in) stored transposed (in, out) for x @ W.
    params['wh'] = (0.1 * jax.random.normal(
        keys[k], (F, F), jnp.float32)).astype(jnp.bfloat16)
    params['bh'] = 0.1 * jax.random.normal(keys[k + 1], (1, F), jnp.float32)
    wfc = 0.1 * jax.random.normal(keys[k + 2], (F, num_classes), jnp.float32)
    bfc = 0.1 * jax.random.normal(keys[k + 3], (1, num_classes), jnp.float32)
    params['wfc'] = jnp.pad(
        wfc, ((0, 0), (0, class_pad - num_classes))).astype(jnp.bfloat16)     # (F, 128)
    params['bfc'] = jnp.pad(bfc, ((0, 0), (0, class_pad - num_classes)))      # (1, 128)
    return params


# ---------------------------------------------------------------------------
# Pure-JAX reference (per-bank conv, same bf16-quantized operands) for checking.
# ---------------------------------------------------------------------------
def _reference_forward(params, x, *, filter_sizes, num_filters, num_classes):
    emb = params['emb'][x].astype(jnp.bfloat16).astype(jnp.float32)   # (B, S, E)
    B, S, E = emb.shape
    max_f = max(filter_sizes)
    wconv = params['w_conv'].astype(jnp.float32).reshape(max_f, E, -1)
    bconv = params['b_conv'][0]
    pooled, off = [], 0
    for f, nf in zip(filter_sizes, num_filters):
        w = wconv[:f, :, off:off + nf]                                # (f, E, nf)
        conv = sum(jnp.einsum('bse,en->bsn', emb[:, j:j + S - f + 1, :], w[j])
                   for j in range(f)) + bconv[off:off + nf]           # (B, S-f+1, nf)
        pooled.append(jnp.max(jax.nn.relu(conv), axis=1))
        off += nf
    pred = jnp.concatenate(pooled, axis=1)                            # (B, F)
    h = pred @ params['wh'].astype(jnp.float32) + params['bh'][0]
    sig = jax.nn.sigmoid(h)
    highway = sig * jax.nn.relu(h) + (1.0 - sig) * pred
    score = (highway @ params['wfc'].astype(jnp.float32)[:, :num_classes]
             + params['bfc'][0, :num_classes])
    return {'pred': jax.nn.log_softmax(score, axis=1),
            'feature': highway, 'score': score}


if __name__ == "__main__":
    # Small, module-consistent shapes.
    batch = 8
    seq_len = 16
    vocab_size = 20
    dis_emb_dim = 32
    filter_sizes = (2, 3, 4)
    num_filters = (32, 32, 64)
    num_filters_total = sum(num_filters)   # 128
    num_classes = 2

    key = jax.random.PRNGKey(0)
    k_param, k_x = jax.random.split(key)
    params = init_params(k_param, seq_len, vocab_size, dis_emb_dim,
                         filter_sizes, num_filters, num_classes)
    x = jax.random.randint(k_x, (batch, seq_len), 0, vocab_size + 1,
                           dtype=jnp.int32)

    fwd = jax.jit(functools.partial(discriminator_forward,
                                    filter_sizes=filter_sizes,
                                    num_classes=num_classes))
    out = fwd(params, x)
    jax.block_until_ready(out)

    assert out['pred'].shape == (batch, num_classes)
    assert out['feature'].shape == (batch, num_filters_total)
    assert out['score'].shape == (batch, num_classes)
    # log_softmax rows must exponentiate-sum to ~1
    assert bool(jnp.allclose(jnp.sum(jnp.exp(out['pred']), axis=1), 1.0,
                             atol=1e-4))
    assert bool(jnp.all(jnp.isfinite(out['feature'])))

    # Numerical check against a pure-JAX per-bank reference.
    ref = _reference_forward(params, x, filter_sizes=filter_sizes,
                             num_filters=num_filters, num_classes=num_classes)
    assert bool(jnp.allclose(out['feature'], ref['feature'], atol=1e-2))
    assert bool(jnp.allclose(out['score'], ref['score'], atol=1e-2))
    assert bool(jnp.allclose(out['pred'], ref['pred'], atol=1e-2))
    print("KERNEL_OK")
</pallas_src>

<mosaic_0001>
module attributes {stable_mosaic.version = 11 : i64} {
  func.func @_fused_kernel(%arg0: i32, %arg1: memref<8x19x32xbf16, #tpu.memory_space<vmem>>, %arg2: memref<128x128xbf16, #tpu.memory_space<vmem>>, %arg3: memref<1x128xf32, #tpu.memory_space<vmem>>, %arg4: memref<16x128xf32, #tpu.memory_space<vmem>>, %arg5: memref<128x128xbf16, #tpu.memory_space<vmem>>, %arg6: memref<1x128xf32, #tpu.memory_space<vmem>>, %arg7: memref<128x128xbf16, #tpu.memory_space<vmem>>, %arg8: memref<1x128xf32, #tpu.memory_space<vmem>>, %arg9: memref<8x128xf32, #tpu.memory_space<vmem>>, %arg10: memref<8x128xf32, #tpu.memory_space<vmem>>, %arg11: memref<8x128xf32, #tpu.memory_space<vmem>>) attributes {dimension_semantics = [#tpu.dimension_semantics<parallel>], iteration_bounds = array<i64: 1>, scalar_prefetch = 0 : i64, scratch_operands = 0 : i64, tpu.core_type = #tpu.core_type<tc>, window_params = [{transform_indices = @transform_0, window_bounds = array<i64: 8, 19, 32>}, {pipeline_mode = #tpu.pipeline_mode<synchronous>, transform_indices = @transform_1, window_bounds = array<i64: 128, 128>}, {pipeline_mode = #tpu.pipeline_mode<synchronous>, transform_indices = @transform_2, window_bounds = array<i64: 1, 128>}, {pipeline_mode = #tpu.pipeline_mode<synchronous>, transform_indices = @transform_3, window_bounds = array<i64: 16, 128>}, {pipeline_mode = #tpu.pipeline_mode<synchronous>, transform_indices = @transform_4, window_bounds = array<i64: 128, 128>}, {pipeline_mode = #tpu.pipeline_mode<synchronous>, transform_indices = @transform_5, window_bounds = array<i64: 1, 128>}, {pipeline_mode = #tpu.pipeline_mode<synchronous>, transform_indices = @transform_6, window_bounds = array<i64: 128, 128>}, {pipeline_mode = #tpu.pipeline_mode<synchronous>, transform_indices = @transform_7, window_bounds = array<i64: 1, 128>}, {transform_indices = @transform_8, window_bounds = array<i64: 8, 128>}, {transform_indices = @transform_9, window_bounds = array<i64: 8, 128>}, {transform_indices = @transform_10, window_bounds = array<i64: 8, 128>}]} {
    %c0 = arith.constant 0 : index
    %c0_0 = arith.constant 0 : index
    %c0_1 = arith.constant 0 : index
    %0 = vector.load %arg1[%c0, %c0_0, %c0_1] : memref<8x19x32xbf16, #tpu.memory_space<vmem>>, vector<8x19x32xbf16>
    %1 = vector.extract_strided_slice %0 {offsets = [0, 0, 0], sizes = [8, 16, 32], strides = [1, 1, 1]} : vector<8x19x32xbf16> to vector<8x16x32xbf16>
    %2 = vector.extract_strided_slice %0 {offsets = [0, 1, 0], sizes = [8, 16, 32], strides = [1, 1, 1]} : vector<8x19x32xbf16> to vector<8x16x32xbf16>
    %3 = vector.extract_strided_slice %0 {offsets = [0, 2, 0], sizes = [8, 16, 32], strides = [1, 1, 1]} : vector<8x19x32xbf16> to vector<8x16x32xbf16>
    %4 = vector.extract_strided_slice %0 {offsets = [0, 3, 0], sizes = [8, 16, 32], strides = [1, 1, 1]} : vector<8x19x32xbf16> to vector<8x16x32xbf16>
    %5 = tpu.concatenate %1, %2, %3, %4 in 2 : vector<8x16x32xbf16>, vector<8x16x32xbf16>, vector<8x16x32xbf16>, vector<8x16x32xbf16> -> vector<8x16x128xbf16>
    %6 = vector.shape_cast %5 : vector<8x16x128xbf16> to vector<128x128xbf16>
    %c0_2 = arith.constant 0 : index
    %c0_3 = arith.constant 0 : index
    %7 = vector.load %arg2[%c0_2, %c0_3] : memref<128x128xbf16, #tpu.memory_space<vmem>>, vector<128x128xbf16>
    %cst = arith.constant dense<0.000000e+00> : vector<128x128xf32>
    %8 = tpu.matmul %6, %7, %cst {dimension_numbers = #tpu.dot_dimension_numbers<[1], [0], [0], [1], [0, 0, 1, 1], [], []>} : vector<128x128xbf16>, vector<128x128xbf16>, vector<128x128xf32> -> vector<128x128xf32>
    %9 = vector.shape_cast %8 : vector<128x128xf32> to vector<8x16x128xf32>
    %c0_4 = arith.constant 0 : index
    %c0_5 = arith.constant 0 : index
    %10 = vector.load %arg3[%c0_4, %c0_5] : memref<1x128xf32, #tpu.memory_space<vmem>>, vector<1x128xf32>
    %11 = vector.shape_cast %10 : vector<1x128xf32> to vector<1x1x128xf32>
    %12 = vector.broadcast %11 : vector<1x1x128xf32> to vector<8x16x128xf32>
    %13 = arith.addf %9, %12 : vector<8x16x128xf32>
    %cst_6 = arith.constant 0.000000e+00 : f32
    %14 = vector.broadcast %cst_6 : f32 to vector<8x16x128xf32>
    %15 = arith.maximumf %13, %14 : vector<8x16x128xf32>
    %c0_7 = arith.constant 0 : index
    %c0_8 = arith.constant 0 : index
    %16 = vector.load %arg4[%c0_7, %c0_8] : memref<16x128xf32, #tpu.memory_space<vmem>>, vector<16x128xf32>
    %17 = vector.shape_cast %16 : vector<16x128xf32> to vector<1x16x128xf32>
    %18 = vector.broadcast %17 : vector<1x16x128xf32> to vector<8x16x128xf32>
    %19 = arith.mulf %15, %18 : vector<8x16x128xf32>
    %cst_9 = arith.constant dense<0xFF800000> : vector<8x128xf32>
    %20 = vector.multi_reduction <maximumf>, %19, %cst_9 [1] : vector<8x16x128xf32> to vector<8x128xf32>
    %21 = arith.truncf %20 : vector<8x128xf32> to vector<8x128xbf16>
    %c0_10 = arith.constant 0 : index
    %c0_11 = arith.constant 0 : index
    %22 = vector.load %arg5[%c0_10, %c0_11] : memref<128x128xbf16, #tpu.memory_space<vmem>>, vector<128x128xbf16>
    %cst_12 = arith.constant dense<0.000000e+00> : vector<8x128xf32>
    %23 = tpu.matmul %21, %22, %cst_12 {dimension_numbers = #tpu.dot_dimension_numbers<[1], [0], [0], [1], [0, 0, 1, 1], [], []>} : vector<8x128xbf16>, vector<128x128xbf16>, vector<8x128xf32> -> vector<8x128xf32>
    %c0_13 = arith.constant 0 : index
    %c0_14 = arith.constant 0 : index
    %24 = vector.load %arg6[%c0_13, %c0_14] : memref<1x128xf32, #tpu.memory_space<vmem>>, vector<1x128xf32>
    %25 = vector.broadcast %24 : vector<1x128xf32> to vector<8x128xf32>
    %26 = arith.addf %23, %25 : vector<8x128xf32>
    %27 = arith.negf %26 : vector<8x128xf32>
    %28 = math.exp %27 : vector<8x128xf32>
    %cst_15 = arith.constant 1.000000e+00 : f32
    %29 = vector.broadcast %cst_15 : f32 to vector<8x128xf32>
    %30 = arith.addf %29, %28 : vector<8x128xf32>
    %31 = arith.divf %29, %30 : vector<8x128xf32>
    %cst_16 = arith.constant 0.000000e+00 : f32
    %32 = vector.broadcast %cst_16 : f32 to vector<8x128xf32>
    %33 = arith.maximumf %26, %32 : vector<8x128xf32>
    %34 = arith.mulf %31, %33 : vector<8x128xf32>
    %cst_17 = arith.constant 1.000000e+00 : f32
    %35 = vector.broadcast %cst_17 : f32 to vector<8x128xf32>
    %36 = arith.subf %35, %31 : vector<8x128xf32>
    %37 = arith.mulf %36, %20 : vector<8x128xf32>
    %38 = arith.addf %34, %37 : vector<8x128xf32>
    %c0_18 = arith.constant 0 : index
    %c0_19 = arith.constant 0 : index
    %39 = vector.load %arg9[%c0_18, %c0_19] : memref<8x128xf32, #tpu.memory_space<vmem>>, vector<8x128xf32>
    tpu.vector_store %arg9[%c0_18, %c0_19], %38 {strides = array<i32>} : memref<8x128xf32, #tpu.memory_space<vmem>>, vector<8x128xf32>,
    %40 = arith.truncf %38 : vector<8x128xf32> to vector<8x128xbf16>
    %c0_20 = arith.constant 0 : index
    %c0_21 = arith.constant 0 : index
    %41 = vector.load %arg7[%c0_20, %c0_21] : memref<128x128xbf16, #tpu.memory_space<vmem>>, vector<128x128xbf16>
    %cst_22 = arith.constant dense<0.000000e+00> : vector<8x128xf32>
    %42 = tpu.matmul %40, %41, %cst_22 {dimension_numbers = #tpu.dot_dimension_numbers<[1], [0], [0], [1], [0, 0, 1, 1], [], []>} : vector<8x128xbf16>, vector<128x128xbf16>, vector<8x128xf32> -> vector<8x128xf32>
    %c0_23 = arith.constant 0 : index
    %c0_24 = arith.constant 0 : index
    %43 = vector.load %arg8[%c0_23, %c0_24] : memref<1x128xf32, #tpu.memory_space<vmem>>, vector<1x128xf32>
    %44 = vector.broadcast %43 : vector<1x128xf32> to vector<8x128xf32>
    %45 = arith.addf %42, %44 : vector<8x128xf32>
    %c0_25 = arith.constant 0 : index
    %c0_26 = arith.constant 0 : index
    %46 = vector.load %arg10[%c0_25, %c0_26] : memref<8x128xf32, #tpu.memory_space<vmem>>, vector<8x128xf32>
    tpu.vector_store %arg10[%c0_25, %c0_26], %45 {strides = array<i32>} : memref<8x128xf32, #tpu.memory_space<vmem>>, vector<8x128xf32>,
    %47 = tpu.iota {dimensions = array<i32: 1>} : vector<8x128xi32>
    %c2_i32 = arith.constant 2 : i32
    %48 = vector.broadcast %c2_i32 : i32 to vector<8x128xi32>
    %49 = arith.cmpi slt, %47, %48 : vector<8x128xi32>
    %cst_27 = arith.constant -1.000000e+30 : f32
    %50 = vector.broadcast %cst_27 : f32 to vector<8x128xf32>
    %51 = arith.select %49, %45, %50 : vector<8x128xi1>, vector<8x128xf32>
    %cst_28 = arith.constant dense<0xFF800000> : vector<8xf32>
    %52 = vector.multi_reduction <maximumf>, %51, %cst_28 [1] : vector<8x128xf32> to vector<8xf32>
    %53 = vector.shape_cast %52 : vector<8xf32> to vector<8x1xf32>
    %54 = vector.broadcast %53 : vector<8x1xf32> to vector<8x128xf32>
    %55 = arith.subf %51, %54 : vector<8x128xf32>
    %56 = math.exp %55 : vector<8x128xf32>
    %cst_29 = arith.constant dense<0.000000e+00> : vector<8xf32>
    %57 = vector.multi_reduction <add>, %56, %cst_29 [1] : vector<8x128xf32> to vector<8xf32>
    %58 = vector.shape_cast %57 : vector<8xf32> to vector<8x1xf32>
    %59 = math.log %58 : vector<8x1xf32>
    %60 = vector.broadcast %59 : vector<8x1xf32> to vector<8x128xf32>
    %61 = arith.subf %55, %60 : vector<8x128xf32>
    %c0_30 = arith.constant 0 : index
    %c0_31 = arith.constant 0 : index
    %62 = vector.load %arg11[%c0_30, %c0_31] : memref<8x128xf32, #tpu.memory_space<vmem>>, vector<8x128xf32>
    tpu.vector_store %arg11[%c0_30, %c0_31], %61 {strides = array<i32>} : memref<8x128xf32, #tpu.memory_space<vmem>>, vector<8x128xf32>,
    return
  }
  func.func @transform_0(%arg0: i32) -> (i32, i32, i32) {
    %c0_i32 = arith.constant 0 : i32
    %c0_i32_0 = arith.constant 0 : i32
    %c0_i32_1 = arith.constant 0 : i32
    return %arg0, %c0_i32, %c0_i32_0 : i32, i32, i32
  }
  func.func @transform_1(%arg0: i32) -> (i32, i32) {
    %c0_i32 = arith.constant 0 : i32
    %c0_i32_0 = arith.constant 0 : i32
    %c0_i32_1 = arith.constant 0 : i32
    return %c0_i32, %c0_i32_0 : i32, i32
  }
  func.func @transform_2(%arg0: i32) -> (i32, i32) {
    %c0_i32 = arith.constant 0 : i32
    %c0_i32_0 = arith.constant 0 : i32
    %c0_i32_1 = arith.constant 0 : i32
    return %c0_i32, %c0_i32_0 : i32, i32
  }
  func.func @transform_3(%arg0: i32) -> (i32, i32) {
    %c0_i32 = arith.constant 0 : i32
    %c0_i32_0 = arith.constant 0 : i32
    %c0_i32_1 = arith.constant 0 : i32
    return %c0_i32, %c0_i32_0 : i32, i32
  }
  func.func @transform_4(%arg0: i32) -> (i32, i32) {
    %c0_i32 = arith.constant 0 : i32
    %c0_i32_0 = arith.constant 0 : i32
    %c0_i32_1 = arith.constant 0 : i32
    return %c0_i32, %c0_i32_0 : i32, i32
  }
  func.func @transform_5(%arg0: i32) -> (i32, i32) {
    %c0_i32 = arith.constant 0 : i32
    %c0_i32_0 = arith.constant 0 : i32
    %c0_i32_1 = arith.constant 0 : i32
    return %c0_i32, %c0_i32_0 : i32, i32
  }
  func.func @transform_6(%arg0: i32) -> (i32, i32) {
    %c0_i32 = arith.constant 0 : i32
    %c0_i32_0 = arith.constant 0 : i32
    %c0_i32_1 = arith.constant 0 : i32
    return %c0_i32, %c0_i32_0 : i32, i32
  }
  func.func @transform_7(%arg0: i32) -> (i32, i32) {
    %c0_i32 = arith.constant 0 : i32
    %c0_i32_0 = arith.constant 0 : i32
    %c0_i32_1 = arith.constant 0 : i32
    return %c0_i32, %c0_i32_0 : i32, i32
  }
  func.func @transform_8(%arg0: i32) -> (i32, i32) {
    %c0_i32 = arith.constant 0 : i32
    %c0_i32_0 = arith.constant 0 : i32
    return %arg0, %c0_i32 : i32, i32
  }
  func.func @transform_9(%arg0: i32) -> (i32, i32) {
    %c0_i32 = arith.constant 0 : i32
    %c0_i32_0 = arith.constant 0 : i32
    return %arg0, %c0_i32 : i32, i32
  }
  func.func @transform_10(%arg0: i32) -> (i32, i32) {
    %c0_i32 = arith.constant 0 : i32
    %c0_i32_0 = arith.constant 0 : i32
    return %arg0, %c0_i32 : i32, i32
  }
}

</mosaic_0001>

<bundles_post_ra>
// kernel: discriminator_forward.1
= control target key start
LH: loop header
LB: loop body
LE: loop exit
PB: predicated region body
PF: predicated region fallthrough
CT: control target
= control target key end

     0   :  { %vm234_vm0 = vcmask 1046528   ;;  %vm121_vm1 = vsmask.f32 7424  ;;  %s1148_s29 = smov 64   ;;  %s1564_s0 = inlined_call_operand.vmem [shape: bf16[8,19,32], index: 0, kind: input, shape index: {}]   ;;  %s1565_s1 = inlined_call_operand.vmem [shape: bf16[128,128], index: 1, kind: input, shape index: {}]   ;;  %s1566_s2 = inlined_call_operand.vmem [shape: f32[1,128], index: 2, kind: input, shape index: {}]   ;;  %s1567_s3 = inlined_call_operand.vmem [shape: f32[16,128], index: 3, kind: input, shape index: {}]   ;;  %s1568_s4 = inlined_call_operand.vmem [shape: bf16[128,128], index: 4, kind: input, shape index: {}]   ;;  %s1569_s5 = inlined_call_operand.vmem [shape: f32[1,128], index: 5, kind: input, shape index: {}]   ;;  %s1570_s6 = inlined_call_operand.vmem [shape: bf16[128,128], index: 6, kind: input, shape index: {}]   ;;  %s1571_s7 = inlined_call_operand.vmem [shape: f32[1,128], index: 7, kind: input, shape index: {}]   ;;  %s1572_s8 = inlined_call_operand.hbm [shape: f32[8,128], index: 8, kind: output, shape index: {0}]   ;;  %s1573_s9 = inlined_call_operand.vmem [shape: f32[8,128], index: 9, kind: output, shape index: {1}]   ;;  %s1574_s10 = inlined_call_operand.vmem [shape: f32[8,128], index: 10, kind: output, shape index: {2}]  }
   0x1   :  { %v1210_v0 = vld [vmem:[%s1564_s0 + $0x3c] sm:$0xff]  ;;  %v50_v1 = vld [vmem:[%s1564_s0 + $0x44] sm:$0x3]  ;;  %v35_v4 = vld [vmem:[%s1564_s0 + $0x8] sm:$0x3] }
   0x2   :  { %v110_v2 = vunpack.c.l.b16 %v50_v1  ;;  %v1218_v3 = vld [vmem:[%s1564_s0] sm:$0xff]  ;;  %v183_v5 = vshrl.u32 %v1210_v0, 16  ;;  %v185_v6 = vshll.u32 %v1210_v0, 16  ;;  %v105_v7 = vunpack.c.l.b16 %v35_v4  ;;  %v38_v8 = vld [vmem:[%s1564_s0 + $0x14] sm:$0x3]  ;;  %v1233_v14 = vld [vmem:[%s1564_s0 + $0xc] sm:$0xff] }
   0x3   :  { %v250_v10 = vrot.slane %v1210_v0, 1  ;;  %v125_v11 = vshll.u32 %v1218_v3, 16  ;;  %v106_v15 = vunpack.c.l.b16 %v38_v8  ;;  %v53_v18 = vld [vmem:[%s1564_s0 + $0x50] sm:$0x3]  ;;  %v123_v20 = vshrl.u32 %v1218_v3, 16  ;;  %v1243_v25 = vld [vmem:[%s1564_s0 + $0x48] sm:$0xff] }
   0x4   :  { %v118_v9 = vpack.c.b16 %v110_v2, %v110_v2  ;;  %v187_v12 = vrot.slane %v185_v6, 1  ;;  %v113_v13 = vpack.c.b16 %v105_v7, %v105_v7  ;;  %v137_v27 = vshll.u32 %v1233_v14, 16 }
   0x5   :  { %v127_v21 = vrot.slane %v125_v11, 1  ;;  %v1246_v26 = vpack.c.b16 %v106_v15, %v106_v15  ;;  %v111_v28 = vunpack.c.l.b16 %v53_v18 }
   0x6   :  { %v251_v16 = vrot.slane %v118_v9, 1  ;;  %v190_v17 = vshll.u32 %v118_v9, 16  ;;  %v188_v19 = vor.u32 %v187_v12, %v183_v5  ;;  %v130_v22 = vshll.u32 %v113_v13, 16 }
   0x8   :  { %v252_v23 = vsel %vm234_vm0, %v250_v10, %v251_v16  ;;  %v192_v24 = vrot.slane %v190_v17, 1 }
   0x9   :  { %269 = vrot.lane.b32.xlu1 %v252_v23, %s1148_s29 }
   0xa   :  { %16 = vsyncpa [#allocation3], 0  ;;  %v193_v29 = vsel %vm121_vm1, %v188_v19, %v192_v24  ;;  %v235_v30 = vrot.slane %v1218_v3, 1  ;;  %v236_v31 = vrot.slane %v113_v13, 1  ;;  %s1149_s30 = smov 32   ;;  %v128_v32 = vor.u32 %v127_v21, %v123_v20  ;;  %s1150_s11 = smov 96  }
   0xb   :  { %228 = vrot.lane.b32.xlu0 %v193_v29, %s1149_s30  ;;  %v132_v33 = vrot.slane %v130_v22, 1  ;;  %v1252_v34 = vpack.c.b16 %v111_v28, %v111_v28  ;;  %v197_v35 = vshll.u32 %v1243_v25, 16  ;;  %v321_v36 = vrot.slane %v183_v5, 1  ;;  %v44_v5 = vld [vmem:[%s1564_s0 + $0x2c] sm:$0x3]  ;;  %s1151_s19 = smov [#allocation2]  }
   0xc   :  { %v135_v37 = vshrl.u32 %v1233_v14, 16  ;;  %v139_v38 = vrot.slane %v137_v27, 1  ;;  %v142_v39 = vshll.u32 %v1246_v26, 16  ;;  %v322_v40 = vrot.slane %v185_v6, 2  ;;  %s911_s20 = sshll.u32 %s1151_s19, 4  ;;  %s912_s20 = int_to_ptr.vmem [resolvable:$true] %s911_s20 }
   0xd   :  { %v237_v41 = vsel %vm234_vm0, %v235_v30, %v236_v31  ;;  %v324_v42 = vshrl.u32 %v118_v9, 16  ;;  %v327_v43 = vrot.slane %v190_v17, 2  ;;  %v133_v44 = vsel %vm121_vm1, %v128_v32, %v132_v33  ;;  %v1284_v17 = vld [vmem:[%s1564_s0 + $0x24] sm:$0xff] }
   0xe   :  { %v195_v45 = vshrl.u32 %v1243_v25, 16  ;;  %v199_v46 = vrot.slane %v197_v35, 1  ;;  %v202_v47 = vshll.u32 %v1252_v34, 16  ;;  %v323_v48 = vor.u32 %v322_v40, %v321_v36 }
   0xf   :  { %v326_v49 = vrot.slane %v324_v42, 1  ;;  %v140_v50 = vor.u32 %v139_v38, %v135_v37  ;;  %v144_v51 = vrot.slane %v142_v39, 1  ;;  %vm275_vm2 = vsmask.f32 6400 }
  0x10   :  { %v333_v52 = vshrl.u32 %v1252_v34, 16  ;;  %v276_v54 = vrot.slane %v123_v20, 1  ;;  %v277_v55 = vrot.slane %v125_v11, 2  ;;  %v279_v56 = vshrl.u32 %v113_v13, 16  ;;  %v41_v13 = vld [vmem:[%s1564_s0 + $0x20] sm:$0x3] }
  0x11   :  { %259 = vrot.lane.b32.xlu1 %v237_v41, %s1148_s29  ;;  %v328_v53 = vor.u32 %v327_v43, %v326_v49  ;;  %v282_v57 = vrot.slane %v130_v22, 2  ;;  %v200_v58 = vor.u32 %v199_v46, %v195_v45  ;;  %v204_v59 = vrot.slane %v202_v47, 1  ;;  %v1291_v20 = vld [vmem:[%s1564_s0 + $0x18] sm:$0xff] }
  0x12   :  { %v330_v61 = vrot.slane %v195_v45, 1  ;;  %v331_v62 = vrot.slane %v197_v35, 2  ;;  %v281_v63 = vrot.slane %v279_v56, 1  ;;  %v145_v1 = vsel %vm121_vm1, %v140_v50, %v144_v51  ;;  %v56_v22 = vld [vmem:[%s1564_s0 + $0x5c] sm:$0x3]  ;;  %v1306_v35 = vld [vmem:[%s1564_s0 + $0x54] sm:$0xff] }
  0x13   :  { %218 = vrot.lane.b32.xlu0 %v133_v44, %s1149_s30  ;;  %v329_v60 = vsel %vm275_vm2, %v323_v48, %v328_v53  ;;  %v335_v2 = vrot.slane %v333_v52, 1  ;;  %v336_v4 = vrot.slane %v202_v47, 2  ;;  %v278_v6 = vor.u32 %v277_v55, %v276_v54 }
  0x14   :  { %358 = vrot.lane.b32.xlu2 %v329_v60, %s1150_s11  ;;  %v283_v7 = vor.u32 %v282_v57, %v281_v63  ;;  %v205_v8 = vsel %vm121_vm1, %v200_v58, %v204_v59  ;;  %v108_v9 = vunpack.c.l.b16 %v44_v5  ;;  %v332_v10 = vor.u32 %v331_v62, %v330_v61 }
  0x15   :  { %v337_v11 = vor.u32 %v336_v4, %v335_v2  ;;  %v238_v15 = vrot.slane %v1233_v14, 1  ;;  %v239_v16 = vrot.slane %v1246_v26, 1  ;;  %v288_v18 = vshrl.u32 %v1246_v26, 16 }
  0x16   :  { %v284_v12 = vsel %vm275_vm2, %v278_v6, %v283_v7  ;;  %v116_v19 = vpack.c.b16 %v108_v9, %v108_v9  ;;  %v107_v21 = vunpack.c.l.b16 %v41_v13  ;;  %v253_v24 = vrot.slane %v1243_v25, 1  ;;  %v1074_v9 = vld [vmem:[%s1565_s1 + $0x38] sm:$0xff] }
  0x17   :  { %v338_v23 = vsel %vm275_vm2, %v332_v10, %v337_v11  ;;  %v254_v28 = vrot.slane %v1252_v34, 1  ;;  %v161_v26 = vshll.u32 %v1284_v17, 16  ;;  %v240_v29 = vsel %vm234_vm0, %v238_v15, %v239_v16  ;;  %1092 = vmatpush.bf16.msra.mxu3 %v1074_v9  ;;  %v1073_v16 = vld [vmem:[%s1565_s1 + $0x30] sm:$0xff]  ;;  %487 = vmatpush.bf16.msra.mxu0 %v1074_v9 }
  0x18   :  { %v285_v30 = vrot.slane %v135_v37, 1  ;;  %v286_v31 = vrot.slane %v137_v27, 2  ;;  %v290_v32 = vrot.slane %v288_v18, 1  ;;  %v291_v33 = vrot.slane %v142_v39, 2  ;;  %1091 = vmatpush.bf16.msra.mxu1 %v1074_v9 }
  0x19   :  { %220 = vrot.lane.b32.xlu1 %v145_v1, %s1149_s30  ;;  %v112_v36 = vunpack.c.l.b16 %v56_v22  ;;  %v244_v34 = vrot.slane %v1284_v17, 1  ;;  %v245_v38 = vrot.slane %v116_v19, 1  ;;  %v1310_v40 = vpack.c.b16 %v107_v21, %v107_v21 }
  0x1a   :  { %v149_v37 = vshll.u32 %v1291_v20, 16  ;;  %v255_v41 = vsel %vm234_vm0, %v253_v24, %v254_v28  ;;  %v159_v27 = vshrl.u32 %v1284_v17, 16  ;;  %v163_v39 = vrot.slane %v161_v26, 1 }
  0x1b   :  { %230 = vrot.lane.b32.xlu0 %v205_v8, %s1149_s30  ;;  %v166_v42 = vshll.u32 %v116_v19, 16  ;;  %v287_v43 = vor.u32 %v286_v31, %v285_v30  ;;  %v292_v44 = vor.u32 %v291_v33, %v290_v32  ;;  %v1316_v45 = vpack.c.b16 %v112_v36, %v112_v36  ;;  %1094 = vmatpush.bf16.msra.mxu3 %v1073_v16 }
  0x1c   :  { %348 = vrot.lane.b32.xlu2 %v284_v12, %s1150_s11  ;;  %v209_v46 = vshll.u32 %v1306_v35, 16  ;;  %v147_v47 = vshrl.u32 %v1291_v20, 16  ;;  %v151_v48 = vrot.slane %v149_v37, 1  ;;  %v154_v49 = vshll.u32 %v1310_v40, 16  ;;  %v47_v12 = vld [vmem:[%s1564_s0 + $0x38] sm:$0x3]  ;;  %488 = vmatpush.bf16.msra.mxu0 %v1073_v16 }
  0x1d   :  { %v246_v50 = vsel %vm234_vm0, %v244_v34, %v245_v38  ;;  %v164_v51 = vor.u32 %v163_v39, %v159_v27  ;;  %v168_v52 = vrot.slane %v166_v42, 1  ;;  %v306_v53 = vshrl.u32 %v116_v19, 16  ;;  %1093 = vmatpush.bf16.msra.mxu1 %v1073_v16 }
  0x1e   :  { %v293_v54 = vsel %vm275_vm2, %v287_v43, %v292_v44  ;;  %v207_v55 = vshrl.u32 %v1306_v35, 16  ;;  %v211_v56 = vrot.slane %v209_v46, 1  ;;  %v214_v57 = vshll.u32 %v1316_v45, 16 }
  0x1f   :  { %v152_v58 = vor.u32 %v151_v48, %v147_v47  ;;  %v156_v59 = vrot.slane %v154_v49, 1  ;;  %v342_v60 = vshrl.u32 %v1316_v45, 16  ;;  %v303_v61 = vrot.slane %v159_v27, 1 }
  0x20   :  { %v169_v62 = vsel %vm121_vm1, %v164_v51, %v168_v52  ;;  %v304_v63 = vrot.slane %v161_v26, 2  ;;  %v308_v1 = vrot.slane %v306_v53, 1  ;;  %v309_v2 = vrot.slane %v166_v42, 2  ;;  %v1072_v26 = vld [vmem:[%s1565_s1 + $0x28] sm:$0xff] }
  0x21   :  { %360 = vrot.lane.b32.xlu1 %v338_v23, %s1150_s11  ;;  %v212_v4 = vor.u32 %v211_v56, %v207_v55  ;;  %v216_v5 = vrot.slane %v214_v57, 1  ;;  %v157_v6 = vsel %vm121_vm1, %v152_v58, %v156_v59  ;;  %v339_v7 = vrot.slane %v207_v55, 1  ;;  %1096 = vmatpush.bf16.msra.mxu3 %v1072_v26  ;;  %v1069_v55 = vld [vmem:[%s1565_s1 + $0x10] sm:$0xff] }
  0x22   :  { %v340_v8 = vrot.slane %v209_v46, 2  ;;  %v344_v10 = vrot.slane %v342_v60, 1  ;;  %v345_v11 = vrot.slane %v214_v57, 2  ;;  %v305_v13 = vor.u32 %v304_v63, %v303_v61  ;;  %489 = vmatpush.bf16.msra.mxu0 %v1072_v26  ;;  %1095 = vmatpush.bf16.msra.mxu1 %v1072_v26 }
  0x23   :  { %261 = vrot.lane.b32.xlu0 %v240_v29, %s1148_s29  ;;  %v310_v15 = vor.u32 %v309_v2, %v308_v1  ;;  %v217_v18 = vsel %vm121_vm1, %v212_v4, %v216_v5  ;;  %v109_v19 = vunpack.c.l.b16 %v47_v12  ;;  %v241_v24 = vrot.slane %v1291_v20, 1  ;;  %v1355_v29 = vld [vmem:[%s1564_s0 + $0x30] sm:$0xff]  ;;  %v1067_v4 = vld [vmem:[%s1565_s1] sm:$0xff] }
  0x24   :  { %271 = vrot.lane.b32.xlu2 %v255_v41, %s1148_s29  ;;  %v341_v21 = vor.u32 %v340_v8, %v339_v7  ;;  %v346_v22 = vor.u32 %v345_v11, %v344_v10  ;;  %v242_v28 = vrot.slane %v1310_v40, 1  ;;  %v297_v30 = vshrl.u32 %v1310_v40, 16  ;;  %v1071_v40 = vld [vmem:[%s1565_s1 + $0x20] sm:$0xff] }
  0x25   :  { %v311_v23 = vsel %vm275_vm2, %v305_v13, %v310_v15  ;;  %v117_v31 = vpack.c.b16 %v109_v19, %v109_v19  ;;  %v256_v33 = vrot.slane %v1306_v35, 1  ;;  %v257_v36 = vrot.slane %v1316_v45, 1  ;;  %1098 = vmatpush.bf16.msra.mxu3 %v1071_v40 }
  0x26   :  { %v347_v32 = vsel %vm275_vm2, %v341_v21, %v346_v22  ;;  %v173_v34 = vshll.u32 %v1355_v29, 16  ;;  %v243_v38 = vsel %vm234_vm0, %v241_v24, %v242_v28  ;;  %v294_v41 = vrot.slane %v147_v47, 1  ;;  %490 = vmatpush.bf16.msra.mxu0 %v1071_v40  ;;  %1097 = vmatpush.bf16.msra.mxu1 %v1071_v40 }
  0x27   :  { %v295_v27 = vrot.slane %v149_v37, 2  ;;  %v299_v39 = vrot.slane %v297_v30, 1  ;;  %v300_v42 = vrot.slane %v154_v49, 2  ;;  %v247_v43 = vrot.slane %v1355_v29, 1  ;;  %v1070_v37 = vld [vmem:[%s1565_s1 + $0x18] sm:$0xff] }
  0x28   :  { %v248_v44 = vrot.slane %v117_v31, 1  ;;  %v258_v45 = vsel %vm234_vm0, %v256_v33, %v257_v36  ;;  %v171_v46 = vshrl.u32 %v1355_v29, 16  ;;  %v175_v48 = vrot.slane %v173_v34, 1 }
  0x29   :  { %265 = vrot.lane.b32.xlu1 %v246_v50, %s1148_s29  ;;  %v178_v50 = vshll.u32 %v117_v31, 16  ;;  %v296_v47 = vor.u32 %v295_v27, %v294_v41  ;;  %v301_v49 = vor.u32 %v300_v42, %v299_v39  ;;  %1100 = vmatpush.bf16.msra.mxu3 %v1070_v37  ;;  %v313_v59 = vrot.slane %v173_v34, 2 }
  0x2a   :  { %v249_v51 = vsel %vm234_vm0, %v247_v43, %v248_v44  ;;  %v176_v52 = vor.u32 %v175_v48, %v171_v46  ;;  %491 = vmatpush.bf16.msra.mxu0 %v1070_v37  ;;  %1099 = vmatpush.bf16.msra.mxu1 %v1070_v37  ;;  %v312_v57 = vrot.slane %v171_v46, 1  ;;  %vm364_vm3 = vcmask 261120  }
  0x2b   :  { %350 = vrot.lane.b32.xlu0 %v293_v54, %s1150_s11  ;;  %v180_v53 = vrot.slane %v178_v50, 1  ;;  %v315_v54 = vshrl.u32 %v117_v31, 16  ;;  %v302_v56 = vsel %vm275_vm2, %v296_v47, %v301_v49  ;;  %v318_v61 = vrot.slane %v178_v50, 2 }
  0x2c   :  { %224 = vrot.lane.b32.xlu2 %v169_v62, %s1149_s30  ;;  %v1068_v62 = vld [vmem:[%s1565_s1 + $0x8] sm:$0xff]  ;;  %v314_v63 = vor.u32 %v313_v59, %v312_v57  ;;  %vm381_vm4 = vcmask 523264   ;;  %vm398_vm5 = vcmask 785408   ;;  %vm690_vm6 = vcmask 1041409  }
  0x2d   :  { %v181_v58 = vsel %vm121_vm1, %v176_v52, %v180_v53  ;;  %v317_v60 = vrot.slane %v315_v54, 1  ;;  %1102 = vmatpush.bf16.msra.mxu3 %v1069_v55  ;;  %vm692_vm7 = vcmask 1042434   ;;  %vm694_vm8 = vcmask 1043459  }
  0x2e   :  { %492 = vmatpush.bf16.msra.mxu0 %v1069_v55  ;;  %1101 = vmatpush.bf16.msra.mxu1 %v1069_v55  ;;  %vm696_vm9 = vcmask 1044484   ;;  %vm698_vm10 = vcmask 1045509   ;;  %vm700_vm11 = vcmask 1046534   ;;  %vm702_vm12 = vcmask 1047559  }
  0x2f   :  { %v319_v1 = vor.u32 %v318_v61, %v317_v60  ;;  %v1437_v60 = vld [vmem:[%s1567_s3 + $0x8] sm:$0xff] }
  0x31   :  { %222 = vrot.lane.b32.xlu1 %v157_v6, %s1149_s30  ;;  %1104 = vmatpush.bf16.msra.mxu3 %v1068_v62  ;;  %v320_v2 = vsel %vm275_vm2, %v314_v63, %v319_v1  ;;  %v1443_v63 = vld [vmem:[%s1567_s3] sm:$0xff] }
  0x32   :  { %493 = vmatpush.bf16.msra.mxu0 %v1068_v62  ;;  %1103 = vmatpush.bf16.msra.mxu1 %v1068_v62 }
  0x33   :  { %232 = vrot.lane.b32.xlu0 %v217_v18, %s1149_s30 }
  0x34   :  { %354 = vrot.lane.b32.xlu2 %v311_v23, %s1150_s11 }
  0x35   :  { %1106 = vmatpush.bf16.msra.mxu3 %v1067_v4 }
  0x36   :  { %494 = vmatpush.bf16.msra.mxu0 %v1067_v4  ;;  %1105 = vmatpush.bf16.msra.mxu1 %v1067_v4 }
  0x39   :  { %362 = vrot.lane.b32.xlu1 %v347_v32, %s1150_s11 }
  0x3b   :  { %263 = vrot.lane.b32.xlu0 %v243_v38, %s1148_s29 }
  0x3c   :  { %273 = vrot.lane.b32.xlu2 %v258_v45, %s1148_s29 }
  0x41   :  { %267 = vrot.lane.b32.xlu1 %v249_v51, %s1148_s29 }
  0x43   :  { %352 = vrot.lane.b32.xlu0 %v302_v56, %s1150_s11 }
  0x44   :  { %226 = vrot.lane.b32.xlu2 %v181_v58, %s1149_s30 }
  0x4c   :  { %356 = vrot.lane.b32.xlu2 %v320_v2, %s1150_s11  ;;  %v1082_v2 = vld [vmem:[%s1568_s4 + $0x38] sm:$0xff] }
  0x4d   :  { %754 = vmatpush.bf16.msrb.mxu1 %v1082_v2 }
  0x6e   :  { %v359_v5 = vpop.permute.xlu2 %358 }
  0x76   :  { %v349_v6 = vpop.permute.xlu2 %348 }
  0x7b   :  { %v270_v7 = vpop.permute.xlu1 %269 }
  0x7d   :  { %v229_v8 = vpop.permute.xlu0 %228 }
  0x7e   :  { %v376_v9 = vsel %vm364_vm3, %v1210_v0, %v229_v8  ;;  %v272_v12 = vpop.permute.xlu2 %271 }
  0x7f   :  { %v393_v10 = vsel %vm381_vm4, %v376_v9, %v270_v7  ;;  %v1081_v7 = vld [vmem:[%s1568_s4 + $0x30] sm:$0xff] }
  0x80   :  { %v415_v11 = vsel %vm398_vm5, %v393_v10, %v359_v5  ;;  %755 = vmatpush.bf16.msrb.mxu1 %v1081_v7 }
  0x81   :  { %520 = vmatmul.bf16.vlgmr.msra.gmra.mxu3 %v415_v11  ;;  %v1080_v11 = vld [vmem:[%s1568_s4 + $0x28] sm:$0xff] }
  0x83   :  { %v260_v13 = vpop.permute.xlu1 %259 }
  0x84   :  { %756 = vmatpush.bf16.msrb.mxu1 %v1080_v11 }
  0x85   :  { %v219_v15 = vpop.permute.xlu0 %218 }
  0x86   :  { %v366_v16 = vsel %vm364_vm3, %v1218_v3, %v219_v15  ;;  %v225_v21 = vpop.permute.xlu2 %224 }
  0x87   :  { %v383_v18 = vsel %vm381_vm4, %v366_v16, %v260_v13  ;;  %v372_v3 = vsel %vm364_vm3, %v1284_v17, %v225_v21 }
  0x88   :  { %v400_v19 = vsel %vm398_vm5, %v383_v18, %v349_v6 }
  0x89   :  { %495 = vmatmul.bf16.vlgmr.msra.gmra.mxu0 %v400_v19 }
  0x8b   :  { %v221_v22 = vpop.permute.xlu1 %220 }
  0x8c   :  { %v368_v33 = vsel %vm364_vm3, %v1233_v14, %v221_v22  ;;  %v1079_v22 = vld [vmem:[%s1568_s4 + $0x20] sm:$0xff] }
  0x8d   :  { %v231_v23 = vpop.permute.xlu0 %230  ;;  %757 = vmatpush.bf16.msrb.mxu1 %v1079_v22 }
  0x8e   :  { %v378_v0 = vsel %vm364_vm3, %v1243_v25, %v231_v23  ;;  %v355_v30 = vpop.permute.xlu2 %354 }
  0x8f   :  { %v395_v28 = vsel %vm381_vm4, %v378_v0, %v272_v12 }
  0x93   :  { %v361_v24 = vpop.permute.xlu1 %360 }
  0x94   :  { %v418_v26 = vsel %vm398_vm5, %v395_v28, %v361_v24 }
  0x95   :  { %525 = vmatmul.bf16.gmra.mxu3 %v418_v26  ;;  %v262_v31 = vpop.permute.xlu0 %261 }
  0x96   :  { %v385_v34 = vsel %vm381_vm4, %v368_v33, %v262_v31  ;;  %v274_v41 = vpop.permute.xlu2 %273  ;;  %v1078_v33 = vld [vmem:[%s1568_s4 + $0x18] sm:$0xff] }
  0x97   :  { %758 = vmatpush.bf16.msrb.mxu1 %v1078_v33 }
  0x9b   :  { %v266_v32 = vpop.permute.xlu1 %265 }
  0x9c   :  { %v389_v36 = vsel %vm381_vm4, %v372_v3, %v266_v32 }
  0x9d   :  { %v351_v25 = vpop.permute.xlu0 %350  ;;  %v409_v38 = vsel %vm398_vm5, %v389_v36, %v355_v30 }
  0x9e   :  { %510 = vmatmul.bf16.vlgmr.msra.gmra.mxu1 %v409_v38  ;;  %v403_v40 = vsel %vm398_vm5, %v385_v34, %v351_v25  ;;  %v227_v42 = vpop.permute.xlu2 %226 }
  0x9f   :  { %500 = vmatmul.bf16.gmra.mxu0 %v403_v40  ;;  %v374_v48 = vsel %vm364_vm3, %v1355_v29, %v227_v42  ;;  %v1430_v29 = vld [vmem:[%s1566_s2] ss:$0 sm:$0xff] }
  0xa3   :  { %v223_v27 = vpop.permute.xlu1 %222 }
  0xa4   :  { %v370_v37 = vsel %vm364_vm3, %v1291_v20, %v223_v27 }
  0xa5   :  { %v233_v39 = vpop.permute.xlu0 %232 }
  0xa6   :  { %v380_v17 = vsel %vm364_vm3, %v1306_v35, %v233_v39  ;;  %v357_v46 = vpop.permute.xlu2 %356 }
  0xa7   :  { %v397_v14 = vsel %vm381_vm4, %v380_v17, %v274_v41 }
  0xab   :  { %v363_v43 = vpop.permute.xlu1 %362 }
  0xac   :  { %v421_v44 = vsel %vm398_vm5, %v397_v14, %v363_v43  ;;  %v1077_v43 = vld [vmem:[%s1568_s4 + $0x10] sm:$0xff] }
  0xad   :  { %530 = vmatmul.bf16.gmra.mxu3 %v421_v44  ;;  %v264_v45 = vpop.permute.xlu0 %263  ;;  %759 = vmatpush.bf16.msrb.mxu1 %v1077_v43 }
  0xae   :  { %v387_v35 = vsel %vm381_vm4, %v370_v37, %v264_v45 }
  0xb3   :  { %v268_v50 = vpop.permute.xlu1 %267 }
  0xb4   :  { %v391_v47 = vsel %vm381_vm4, %v374_v48, %v268_v50 }
  0xb5   :  { %v353_v49 = vpop.permute.xlu0 %352  ;;  %v412_v51 = vsel %vm398_vm5, %v391_v47, %v357_v46 }
  0xb6   :  { %515 = vmatmul.bf16.gmra.mxu1 %v412_v51  ;;  %v406_v52 = vsel %vm398_vm5, %v387_v35, %v353_v49  ;;  %v1076_v35 = vld [vmem:[%s1568_s4 + $0x8] sm:$0xff] }
  0xb7   :  { %505 = vmatmul.bf16.gmra.mxu0 %v406_v52  ;;  %760 = vmatpush.bf16.msrb.mxu1 %v1076_v35 }
 0x104   :  { %v521_v54 = vpop.f32.mrf.mxu3 }
 0x105   :  { %v550_v3 = vadd.f32 %v1430_v29, %v521_v54 }
 0x106   :  { %v496_v53 = vpop.f32.mrf.mxu0 }
 0x107   :  { %v540_v56 = vadd.f32 %v1430_v29, %v496_v53  ;;  %v566_v39 = vmax.f32 %v550_v3, 0.0 }
 0x109   :  { %v556_v59 = vmax.f32 %v540_v56, 0.0  ;;  %v584_v49 = vmul.f32 %v1443_v63, %v566_v39  ;;  %v1075_v56 = vld [vmem:[%s1568_s4] sm:$0xff] }
 0x10a   :  { %761 = vmatpush.bf16.msrb.mxu1 %v1075_v56 }
 0x10b   :  { %v574_v4 = vmul.f32 %v1443_v63, %v556_v59 }
 0x10c   :  { %v523_v57 = vpop.f32.mrf.mxu3 }
 0x10d   :  { %v551_v24 = vadd.f32 %v1430_v29, %v523_v57 }
 0x10e   :  { %v498_v55 = vpop.f32.mrf.mxu0 }
 0x10f   :  { %v541_v20 = vadd.f32 %v1430_v29, %v498_v55  ;;  %v567_v25 = vmax.f32 %v551_v24, 0.0 }
 0x111   :  { %v557_v58 = vmax.f32 %v541_v20, 0.0  ;;  %v585_v45 = vmul.f32 %v1437_v60, %v567_v25 }
 0x113   :  { %v575_v61 = vmul.f32 %v1437_v60, %v557_v58  ;;  %v625_v20 = vmax.f32 %v584_v49, %v585_v45 }
 0x115   :  { %v590_v6 = vmax.f32 %v574_v4, %v575_v61  ;;  %v626_v7 = vrot.slane %v625_v20, 4 }
 0x117   :  { %v591_v9 = vrot.slane %v590_v6, 4  ;;  %v627_v22 = vmax.f32 %v625_v20, %v626_v7 }
 0x118   :  { %v526_v5 = vpop.f32.mrf.mxu3 }
 0x119   :  { %v592_v16 = vmax.f32 %v590_v6, %v591_v9  ;;  %v552_v36 = vadd.f32 %v1430_v29, %v526_v5 }
 0x11b   :  { %v511_v62 = vpop.f32.mrf.mxu1  ;;  %v593_v26 = vrot.slane %v592_v16, 2  ;;  %v568_v14 = vmax.f32 %v552_v36, 0.0  ;;  %v628_v36 = vrot.slane %v627_v22, 2 }
 0x11c   :  { %v501_v1 = vpop.f32.mrf.mxu0  ;;  %v546_v28 = vadd.f32 %v1430_v29, %v511_v62 }
 0x11d   :  { %v542_v8 = vadd.f32 %v1430_v29, %v501_v1  ;;  %v594_v40 = vmax.f32 %v592_v16, %v593_v26  ;;  %v586_v53 = vmul.f32 %v1443_v63, %v568_v14 }
 0x11e   :  { %v562_v38 = vmax.f32 %v546_v28, 0.0 }
 0x11f   :  { %v558_v12 = vmax.f32 %v542_v8, 0.0  ;;  %v595_v48 = vrot.slane %v594_v40, 1 }
 0x120   :  { %v528_v19 = vpop.f32.mrf.mxu3  ;;  %v580_v46 = vmul.f32 %v1443_v63, %v562_v38 }
 0x121   :  { %v576_v23 = vmul.f32 %v1443_v63, %v558_v12  ;;  %v553_v30 = vadd.f32 %v1430_v29, %v528_v19  ;;  %v1487_v57 = vmax.f32 %v594_v40, %v595_v48 }
 0x123   :  { %v513_v13 = vpop.f32.mrf.mxu1  ;;  %v569_v41 = vmax.f32 %v553_v30, 0.0 }
 0x124   :  { %v503_v10 = vpop.f32.mrf.mxu0  ;;  %v547_v21 = vadd.f32 %v1430_v29, %v513_v13 }
 0x125   :  { %v543_v15 = vadd.f32 %v1430_v29, %v503_v10  ;;  %v587_v50 = vmul.f32 %v1437_v60, %v569_v41 }
 0x126   :  { %v563_v32 = vmax.f32 %v547_v21, 0.0 }
 0x127   :  { %v559_v18 = vmax.f32 %v543_v15, 0.0  ;;  %v632_v58 = vmax.f32 %v586_v53, %v587_v50 }
 0x128   :  { %v581_v17 = vmul.f32 %v1437_v60, %v563_v32 }
 0x129   :  { %v577_v0 = vmul.f32 %v1437_v60, %v559_v18  ;;  %v633_v8 = vrot.slane %v632_v58, 4 }
 0x12a   :  { %v611_v51 = vmax.f32 %v580_v46, %v581_v17  ;;  %v629_v17 = vmax.f32 %v627_v22, %v628_v36  ;;  %v1086_v36 = vld [vmem:[%s1570_s6 + $0x18] sm:$0xff] }
 0x12b   :  { %v597_v31 = vmax.f32 %v576_v23, %v577_v0  ;;  %v634_v0 = vmax.f32 %v632_v58, %v633_v8 }
 0x12c   :  { %v612_v61 = vrot.slane %v611_v51, 4  ;;  %v630_v48 = vrot.slane %v629_v17, 1 }
 0x12d   :  { %v598_v34 = vrot.slane %v597_v31, 4  ;;  %v635_v25 = vrot.slane %v634_v0, 2 }
 0x12e   :  { %v613_v11 = vmax.f32 %v611_v51, %v612_v61  ;;  %v631_v53 = vmax.f32 %v629_v17, %v630_v48 }
 0x12f   :  { %v599_v27 = vmax.f32 %v597_v31, %v598_v34  ;;  %v636_v43 = vmax.f32 %v634_v0, %v635_v25  ;;  %v1112_v25 = vld [vmem:[%s1569_s5] ss:$0 sm:$0xff] }
 0x130   :  { %v531_v42 = vpop.f32.mrf.mxu3  ;;  %v614_v26 = vrot.slane %v613_v11, 2 }
 0x131   :  { %v600_v44 = vrot.slane %v599_v27, 2  ;;  %v554_v55 = vadd.f32 %v1430_v29, %v531_v42 }
 0x132   :  { %v615_v40 = vmax.f32 %v613_v11, %v614_v26 }
 0x133   :  { %v601_v37 = vmax.f32 %v599_v27, %v600_v44  ;;  %v516_v47 = vpop.f32.mrf.mxu1  ;;  %v570_v4 = vmax.f32 %v554_v55, 0.0 }
 0x134   :  { %v506_v52 = vpop.f32.mrf.mxu0  ;;  %v548_v62 = vadd.f32 %v1430_v29, %v516_v47  ;;  %v616_v44 = vrot.slane %v615_v40, 1 }
 0x135   :  { %v602_v54 = vrot.slane %v601_v37, 1  ;;  %v544_v5 = vadd.f32 %v1430_v29, %v506_v52  ;;  %v588_v16 = vmul.f32 %v1443_v63, %v570_v4 }
 0x136   :  { %v564_v12 = vmax.f32 %v548_v62, 0.0  ;;  %v617_v47 = vmax.f32 %v615_v40, %v616_v44  ;;  %v1083_v40 = vld [vmem:[%s1570_s6] sm:$0xff] }
 0x137   :  { %v1489_v59 = vmax.f32 %v601_v37, %v602_v54  ;;  %v560_v18 = vmax.f32 %v544_v5, 0.0  ;;  %v646_v54 = vpack.c.bf16 %v1487_v57, %v1487_v57  ;;  %v651_v5 = vpack.c.bf16 %v631_v53, %v631_v53 }
 0x138   :  { %v533_v1 = vpop.f32.mrf.mxu3  ;;  %v582_v30 = vmul.f32 %v1443_v63, %v564_v12  ;;  %v649_v58 = vpack.c.bf16 %v617_v47, %v617_v47 }
 0x139   :  { %v1495_v2 = vsel %vm690_vm6, %v1489_v59, %v1487_v57  ;;  %v555_v6 = vadd.f32 %v1430_v29, %v533_v1  ;;  %v578_v3 = vmul.f32 %v1443_v63, %v560_v18  ;;  %v647_v35 = vpack.c.bf16 %v1489_v59, %v1489_v59 }
 0x13a   :  { %v687_v18 = vunpack.c.l.b16 %v651_v5 }
 0x13b   :  { %v571_v9 = vmax.f32 %v555_v6, 0.0  ;;  %v518_v10 = vpop.f32.mrf.mxu1  ;;  %v683_v61 = vunpack.c.l.b16 %v647_v35  ;;  %v682_v6 = vunpack.c.l.b16 %v646_v54  ;;  %v891_v54 = vlaneseq }
 0x13c   :  { %v549_v13 = vadd.f32 %v1430_v29, %v518_v10  ;;  %v508_v15 = vpop.f32.mrf.mxu0  ;;  %v685_v10 = vunpack.c.l.b16 %v649_v58 }
 0x13d   :  { %v589_v19 = vmul.f32 %v1437_v60, %v571_v9  ;;  %v545_v21 = vadd.f32 %v1430_v29, %v508_v15  ;;  %v691_v12 = vsel %vm690_vm6, %v683_v61, %v682_v6 }
 0x13e   :  { %v565_v23 = vmax.f32 %v549_v13, 0.0 }
 0x13f   :  { %v639_v24 = vmax.f32 %v588_v16, %v589_v19  ;;  %v561_v28 = vmax.f32 %v545_v21, 0.0 }
 0x140   :  { %v583_v31 = vmul.f32 %v1437_v60, %v565_v23 }
 0x141   :  { %v640_v32 = vrot.slane %v639_v24, 4  ;;  %v579_v33 = vmul.f32 %v1437_v60, %v561_v28  ;;  %v637_v60 = vrot.slane %v636_v43, 1 }
 0x142   :  { %v618_v34 = vmax.f32 %v582_v30, %v583_v31  ;;  %v1090_v31 = vld [vmem:[%s1570_s6 + $0x38] sm:$0xff] }
 0x143   :  { %v641_v38 = vmax.f32 %v639_v24, %v640_v32  ;;  %v604_v29 = vmax.f32 %v578_v3, %v579_v33  ;;  %v638_v20 = vmax.f32 %v636_v43, %v637_v60  ;;  %877 = vmatpush.bf16.msra.mxu2 %v1090_v31  ;;  %v1089_v3 = vld [vmem:[%s1570_s6 + $0x30] sm:$0xff]  ;;  %v1088_v32 = vld [vmem:[%s1570_s6 + $0x28] sm:$0xff]  ;;  %v1087_v33 = vld [vmem:[%s1570_s6 + $0x20] sm:$0xff] }
 0x144   :  { %v619_v41 = vrot.slane %v618_v34, 4 }
 0x145   :  { %v642_v27 = vrot.slane %v641_v38, 2  ;;  %v605_v39 = vrot.slane %v604_v29, 4  ;;  %v652_v8 = vpack.c.bf16 %v638_v20, %v638_v20 }
 0x146   :  { %v620_v42 = vmax.f32 %v618_v34, %v619_v41  ;;  %v1085_v34 = vld [vmem:[%s1570_s6 + $0x10] sm:$0xff] }
 0x147   :  { %v606_v14 = vmax.f32 %v604_v29, %v605_v39  ;;  %v643_v45 = vmax.f32 %v641_v38, %v642_v27  ;;  %v688_v22 = vunpack.c.l.b16 %v652_v8  ;;  %878 = vmatpush.bf16.msra.mxu2 %v1089_v3  ;;  %v1084_v38 = vld [vmem:[%s1570_s6 + $0x8] sm:$0xff] }
 0x148   :  { %v621_v46 = vrot.slane %v620_v42, 2 }
 0x149   :  { %v607_v63 = vrot.slane %v606_v14, 2  ;;  %v644_v49 = vrot.slane %v643_v45, 1 }
 0x14a   :  { %v622_v50 = vmax.f32 %v620_v42, %v621_v46 }
 0x14b   :  { %v608_v37 = vmax.f32 %v606_v14, %v607_v63  ;;  %v645_v62 = vmax.f32 %v643_v45, %v644_v49  ;;  %879 = vmatpush.bf16.msra.mxu2 %v1088_v32 }
 0x14c   :  { %v623_v51 = vrot.slane %v622_v50, 1 }
 0x14d   :  { %v609_v52 = vrot.slane %v608_v37, 1  ;;  %v653_v11 = vpack.c.bf16 %v645_v62, %v645_v62 }
 0x14e   :  { %v624_v55 = vmax.f32 %v622_v50, %v623_v51 }
 0x14f   :  { %v610_v56 = vmax.f32 %v608_v37, %v609_v52  ;;  %v689_v0 = vunpack.c.l.b16 %v653_v11  ;;  %880 = vmatpush.bf16.msra.mxu2 %v1087_v33 }
 0x150   :  { %v650_v1 = vpack.c.bf16 %v624_v55, %v624_v55 }
 0x151   :  { %v648_v4 = vpack.c.bf16 %v610_v56, %v610_v56  ;;  %v798_v59 = vsel %vm692_vm7, %v610_v56, %v1495_v2 }
 0x152   :  { %v799_v57 = vsel %vm694_vm8, %v617_v47, %v798_v59  ;;  %v686_v15 = vunpack.c.l.b16 %v650_v1 }
 0x153   :  { %v684_v7 = vunpack.c.l.b16 %v648_v4  ;;  %v800_v9 = vsel %vm696_vm9, %v624_v55, %v799_v57  ;;  %881 = vmatpush.bf16.msra.mxu2 %v1086_v36  ;;  %v892_v55 = vand.u32 127, %v891_v54 }
 0x154   :  { %v801_v13 = vsel %vm698_vm10, %v631_v53, %v800_v9 }
 0x155   :  { %v693_v2 = vsel %vm692_vm7, %v684_v7, %v691_v12  ;;  %v802_v16 = vsel %vm700_vm11, %v638_v20, %v801_v13  ;;  %v1113_v20 = vld [vmem:[%s1571_s7] ss:$0 sm:$0xff]  ;;  %vm893_vm1 = vcmp.lt.s32.totalorder %v892_v55, 2  ;;  %s913_s7 = sshll.u32 %s1572_s8, 4  ;;  %s914_s7 = int_to_ptr.hbm [resolvable:$true] %s913_s7 }
 0x156   :  { %v695_v19 = vsel %vm694_vm8, %v685_v10, %v693_v2  ;;  %v803_v21 = vsel %vm702_vm12, %v645_v62, %v802_v16 }
 0x157   :  { %v697_v23 = vsel %vm696_vm9, %v686_v15, %v695_v19  ;;  %882 = vmatpush.bf16.msra.mxu2 %v1085_v34 }
 0x158   :  { %v699_v24 = vsel %vm698_vm10, %v687_v18, %v697_v23 }
 0x159   :  { %v701_v28 = vsel %vm700_vm11, %v688_v22, %v699_v24 }
 0x15a   :  { %v703_v26 = vsel %vm702_vm12, %v689_v0, %v701_v28 }
 0x15b   :  { %v704_v30 = vpack.c.b16 %v703_v26, %v703_v26  ;;  %883 = vmatpush.bf16.msra.mxu2 %v1084_v38 }
 0x15d   :  { %762 = vmatmul.bf16.vlgmr.msrb.gmra.mxu1 %v704_v30 }
 0x15f   :  { %884 = vmatpush.bf16.msra.mxu2 %v1083_v40 }
 0x1da   :  { %v763_v29 = vpop.f32.mrf.mxu1 }
 0x1db   :  { %v764_v41 = vadd.f32 %v1112_v25, %v763_v29 }
 0x1dd   :  { %v1026_v27 = vmul.f32 -1.442695, %v764_v41  ;;  %v786_v47 = vmax.f32 %v764_v41, 0.0 }
 0x1df   :  { %1114 = vpow2.f32 %v1026_v27 }
 0x1e2   :  { %v765_v39 = vpop.f32.mrf.mxu1 }
 0x1e5   :  { %v1115_v17 = vpop.eup %1114 }
 0x1e6   :  { %v770_v42 = vadd.f32 1.0, %v1115_v17 }
 0x1e8   :  { %1116 = vrcp.f32 %v770_v42  ;;  %v782_v45 = vand.u32 2147483648, %v770_v42  ;;  %v780_v63 = vand.u32 2147483647, %v770_v42  ;;  %vm776_vm14 = vweird.f32 %v770_v42 }
 0x1ea   :  { %v783_v50 = vor.u32 1.1754944e-38, %v782_v45  ;;  %vm781_vm0 = vcmp.eq.f32.partialorder %v780_v63, 8.507059e+37 }
 0x1ee   :  { %v1117_v43 = vpop.eup %1116 }
 0x1ef   :  { %v772_v14 = vmul.f32 %v1117_v43, %v770_v42  ;;  %vm777_vm13 = vweird.f32 %v1117_v43 }
 0x1f0   :  { %vm778_vm15 = vmor %vm776_vm14, %vm777_vm13 }
 0x1f1   :  { %v773_v44 = vsub.f32 1.0, %v772_v14 }
 0x1f3   :  { %v774_v46 = vmul.f32 %v1117_v43, %v773_v44 }
 0x1f5   :  { %v775_v48 = vadd.f32 %v1117_v43, %v774_v46 }
 0x1f7   :  { %v779_v60 = vsel %vm778_vm15, %v1117_v43, %v775_v48 }
 0x1f8   :  { %v784_v37 = vsel %vm781_vm0, %v783_v50, %v779_v60 }
 0x1f9   :  { %v788_v35 = vsub.f32 1.0, %v784_v37  ;;  %v787_v49 = vmul.f32 %v786_v47, %v784_v37 }
 0x1fb   :  { %v805_v51 = vmul.f32 %v803_v21, %v788_v35 }
 0x1fd   :  { %v806_v52 = vadd.f32 %v805_v51, %v787_v49 }
 0x1ff   :  { %v808_v53 = vpack.c.bf16 %v806_v52, %v806_v52  ;;  %807 = vst [vmem:[#allocation2] sm:$0xff] %v806_v52 }
 0x200   :  { %916 = dma.vmem_to_hbm [thread:$0]  %s912_s20, 128, %s914_s7, [#allocation3]  }
 0x201   :  { %885 = vmatmul.bf16.vlgmr.msra.gmra.mxu2 %v808_v53 }
 0x284   :  { %v886_v56 = vpop.f32.mrf.mxu2 }
 0x285   :  { %v887_v58 = vadd.f32 %v1113_v20, %v886_v56 }
 0x287   :  { %890 = vst [vmem:[%s1573_s9] sm:$0xff] %v887_v58  ;;  %v894_v61 = vsel %vm893_vm1, %v887_v58, -1e+30 }
 0x288   :  { %895 = vmax.xlane.f32.xlu0 %v894_v61 }
 0x28c   :  { %v888_v62 = vpop.f32.mrf.mxu2 }
 0x2fb   :  { %v896_v1 = vpop.xlane.xlu0 %895 }
 0x2fc   :  { %v897_v4 = vsub.f32 %v894_v61, %v896_v1 }
 0x2fe   :  { %v898_v59 = vmul.f32 1.442695, %v897_v4 }
 0x300   :  { %1118 = vpow2.f32 %v898_v59 }
 0x306   :  { %v1119_v5 = vpop.eup %1118 }
 0x307   :  { %900 = vadd.xlane.f32.xlu1 %v1119_v5 }
 0x37a   :  { %v901_v6 = vpop.xlane.xlu1 %900 }
 0x37b   :  { %1120 = vlog2.f32 %v901_v6 }
 0x381   :  { %v1121_v57 = vpop.eup %1120 }
 0x382   :  { %v903_v7 = vmul.f32 0.6931472, %v1121_v57 }
 0x384   :  { %v904_v8 = vsub.f32 %v897_v4, %v903_v7 }
 0x386   :  { %905 = vst [vmem:[%s1574_s10] sm:$0xff] %v904_v8 }
 0x387   :  { %1146 = dma.done.wait [#allocation3], 128  }
 0x388   :  { %1147 = vsyncadd [#allocation3], 4294967168 }
 0x389   :  { %929 = vsyncpa [#allocation3], 1 }

</bundles_post_ra>
